<compile_context>
chip_gen: v7x
topology: tpu7x:2x2x1
jax: 0.10.0
libtpu: 0.0.40
codegen_flags: <defaults>
</compile_context>

<pallas_src>
import functools

import jax
import jax.numpy as jnp
import numpy as np
from jax.experimental import pallas as pl
from jax.experimental.pallas import tpu as pltpu

SENSOR_DIM = 32
HIDDEN_DIM = 64
OUTPUT_DIM = 16
NUM_RESBLOCKS = 2          # encoder resblocks; +1 post-encoding resblock
TOTAL_RB = NUM_RESBLOCKS + 1

DEFAULT_BATCH_TILE = 2048  # tunable; 512-4096 all fit comfortably in VMEM


def _round_up(x, m):
    return ((x + m - 1) // m) * m


def _cdiv(a, b):
    return -(-a // b)


def _choose_tile(batch, batch_tile):
    """Pick a sublane-aligned batch tile and an (ideally even) grid length."""
    b8 = _round_up(max(batch, 1), 8)
    tile = max(8, min(_round_up(batch_tile, 8), b8))
    n_steps = _cdiv(b8, tile)
    # Prefer an even number of grid steps (>= 2) so the "parallel" batch axis
    # can shard across both TensorCores on v7x.  No effect on v5e/v6e (1 TC).
    if n_steps % 2 == 1 and b8 > 8:
        n_steps += 1
        tile = max(8, _round_up(_cdiv(b8, n_steps), 8))
        n_steps = _cdiv(b8, tile)
    return tile, n_steps, tile * n_steps


def _blockdiag2(w):
    """(k, n) -> (2k, 2n) with w on both diagonal blocks."""
    z = jnp.zeros_like(w)
    return jnp.concatenate(
        [jnp.concatenate([w, z], axis=1), jnp.concatenate([z, w], axis=1)],
        axis=0)


# -----------------------------------------------------------------------------
# Kernel
# -----------------------------------------------------------------------------
def _fused_kernel(x_ref, w0_ref, b0_ref, wrb_ref, brb_ref,
                  wha_ref, bha_ref, whq2_ref, bhq2_ref, out_ref):
    dot_dtype = w0_ref.dtype          # bf16 (perf path) or f32

    def mm(a, w):
        # MXU matmul, f32 accumulation.
        return jnp.dot(a, w, preferred_element_type=jnp.float32)

    # x is already in the MXU dtype (cast in the wrapper for the bf16 path).
    x = x_ref[...]                    # (tile, 2S) when HQ is lane-packed, else (tile, S)

    # Encoder first Linear + ReLU (block-diagonal weights when HQ is packed).
    h_f32 = jnp.maximum(mm(x, w0_ref[...]) + b0_ref[...], 0.0)
    h = h_f32.astype(dot_dtype)       # single cast per layer output (no-op in f32 path)

    # TOTAL_RB residual blocks (encoder resblocks + post-encoding resblock),
    # unrolled.  Bias / ReLU / residual math stays in f32.
    for i in range(TOTAL_RB):
        t = jnp.maximum(mm(h, wrb_ref[2 * i]) + brb_ref[2 * i], 0.0)
        h_f32 = jnp.maximum(mm(t.astype(dot_dtype), wrb_ref[2 * i + 1])
                            + brb_ref[2 * i + 1] + h_f32, 0.0)
        h = h_f32.astype(dot_dtype)

    # Heads operate on the LQ half of the lane-packed encoding.
    enc_lq = h[:, :HIDDEN_DIM]
    # Fused hq_reconstructor-first-Linear + actuator_head: one dot on enc_lq.
    z = mm(enc_lq, wha_ref[...]) + bha_ref[...]        # (tile, H + OUT)
    hq_h = jnp.maximum(z[:, :HIDDEN_DIM], 0.0)         # ReLU only on hq branch
    act = z[:, HIDDEN_DIM:]                            # actuator command (no ReLU)
    rec = mm(hq_h.astype(dot_dtype), whq2_ref[...]) + bhq2_ref[...]

    # Single lane-dense packed output slab: [enc_lq | (enc_hq) | rec | act | pad].
    pieces = [h_f32, rec, act]
    npad = out_ref.shape[-1] - (h_f32.shape[-1] + SENSOR_DIM + OUTPUT_DIM)
    if npad > 0:
        pieces.append(jnp.zeros((h_f32.shape[0], npad), jnp.float32))
    out_ref[...] = jnp.concatenate(pieces, axis=-1).astype(out_ref.dtype)


# -----------------------------------------------------------------------------
# Wrapper (jitted so padding / weight prep / casts / slicing fuse with the call)
# -----------------------------------------------------------------------------
@functools.partial(jax.jit, static_argnames=("batch_tile", "use_bf16"))
def _forward_impl(params, x_lq, x_hq, batch_tile, use_bf16):
    has_hq = x_hq is not None
    (we, be, rbw1, rbb1, rbw2, rbb2, whq1, bhq1, whq2, bhq2, wact, bact) = params

    B = x_lq.shape[0]
    tile, n_steps, Bp = _choose_tile(B, batch_tile)

    # ---- input packing: LQ|HQ along lanes, cast, pad the batch -------------
    x = jnp.concatenate([x_lq, x_hq], axis=-1) if has_hq else x_lq
    if use_bf16:
        x = x.astype(jnp.bfloat16)
    if Bp != B:
        x = jnp.pad(x, ((0, Bp - B), (0, 0)))
    in_dim = x.shape[-1]

    # ---- weight prep --------------------------------------------------------
    # Fuse hq_reconstructor first Linear with actuator_head (same LHS).
    wha = jnp.concatenate([whq1, wact], axis=1)         # (H, H+OUT)
    bha = jnp.concatenate([bhq1, bact], axis=1)         # (1, H+OUT)

    if has_hq:
        w0 = _blockdiag2(we)                            # (2S, 2H)
        b0 = jnp.concatenate([be, be], axis=1)          # (1, 2H)
        wrb_list, brb_list = [], []
        for i in range(TOTAL_RB):
            wrb_list += [_blockdiag2(rbw1[i]), _blockdiag2(rbw2[i])]
            brb_list += [jnp.concatenate([rbb1[i], rbb1[i]], axis=1),
                         jnp.concatenate([rbb2[i], rbb2[i]], axis=1)]
    else:
        w0, b0 = we, be
        wrb_list, brb_list = [], []
        for i in range(TOTAL_RB):
            wrb_list += [rbw1[i], rbw2[i]]
            brb_list += [rbb1[i], rbb2[i]]
    wrb = jnp.stack(wrb_list)                           # (2*RB, H2, H2)
    brb = jnp.stack(brb_list)                           # (2*RB, 1, H2)

    if use_bf16:
        w0, wrb, wha_k, whq2_k = (a.astype(jnp.bfloat16)
                                  for a in (w0, wrb, wha, whq2))
    else:
        wha_k, whq2_k = wha, whq2

    weight_args = [w0, b0, wrb, brb, wha_k, bha, whq2_k, bhq2]

    # ---- pallas_call --------------------------------------------------------
    enc_w = 2 * HIDDEN_DIM if has_hq else HIDDEN_DIM
    raw_w = enc_w + SENSOR_DIM + OUTPUT_DIM             # 176 (HQ) / 112 (no HQ)
    out_w = raw_w if has_hq else _round_up(raw_w, 128)  # 176 / 128 (lane-dense)
    out_dtype = jnp.bfloat16 if use_bf16 else jnp.float32

    def w_spec(a):
        nd = a.ndim
        return pl.BlockSpec(a.shape, lambda i, _nd=nd: (0,) * _nd)

    in_specs = ([pl.BlockSpec((tile, in_dim), lambda i: (i, 0))]
                + [w_spec(a) for a in weight_args])

    packed = pl.pallas_call(
        _fused_kernel,
        out_shape=jax.ShapeDtypeStruct((Bp, out_w), out_dtype),
        grid_spec=pltpu.PrefetchScalarGridSpec(
            num_scalar_prefetch=0,
            grid=(n_steps,),
            in_specs=in_specs,
            out_specs=pl.BlockSpec((tile, out_w), lambda i: (i, 0)),
        ),
        compiler_params=pltpu.CompilerParams(
            dimension_semantics=("parallel",),
        ),
    )(x, *weight_args)

    # ---- unpack (fuses with the pallas_call under jit) ----------------------
    packed = packed[:B].astype(jnp.float32)
    enc_lq = packed[:, :HIDDEN_DIM]
    enc_hq = packed[:, HIDDEN_DIM:2 * HIDDEN_DIM] if has_hq else None
    rec = packed[:, enc_w:enc_w + SENSOR_DIM]
    act = packed[:, enc_w + SENSOR_DIM:enc_w + SENSOR_DIM + OUTPUT_DIM]
    return rec, act, enc_lq, enc_hq


def sensor_augmentor_forward(params, x_lq, x_hq=None, *,
                             batch_tile=DEFAULT_BATCH_TILE, use_bf16=True):
    """Fused forward. Returns (reconstructed_hq, act_command, encoded_lq,
    encoded_hq_or_None), matching the PyTorch module."""
    return _forward_impl(params, x_lq, x_hq,
                         batch_tile=batch_tile, use_bf16=use_bf16)


# -----------------------------------------------------------------------------
# Deterministic parameter init (PyTorch nn.Linear-style uniform), weights
# stored pre-transposed to (in, out).
# -----------------------------------------------------------------------------
def init_params(key):
    def linear(key, fan_in, fan_out):
        kw, kb = jax.random.split(key)
        bound = 1.0 / np.sqrt(fan_in)
        w = jax.random.uniform(kw, (fan_in, fan_out), jnp.float32, -bound, bound)
        b = jax.random.uniform(kb, (1, fan_out), jnp.float32, -bound, bound)
        return w, b

    keys = jax.random.split(key, 5 + 2 * TOTAL_RB)
    ki = iter(keys)

    we, be = linear(next(ki), SENSOR_DIM, HIDDEN_DIM)

    rbw1, rbb1, rbw2, rbb2 = [], [], [], []
    for _ in range(TOTAL_RB):
        w1, b1 = linear(next(ki), HIDDEN_DIM, HIDDEN_DIM)
        w2, b2 = linear(next(ki), HIDDEN_DIM, HIDDEN_DIM)
        rbw1.append(w1); rbb1.append(b1); rbw2.append(w2); rbb2.append(b2)
    rbw1 = jnp.stack(rbw1); rbb1 = jnp.stack(rbb1)
    rbw2 = jnp.stack(rbw2); rbb2 = jnp.stack(rbb2)

    whq1, bhq1 = linear(next(ki), HIDDEN_DIM, HIDDEN_DIM)
    whq2, bhq2 = linear(next(ki), HIDDEN_DIM, SENSOR_DIM)
    wact, bact = linear(next(ki), HIDDEN_DIM, OUTPUT_DIM)

    return (we, be, rbw1, rbb1, rbw2, rbb2, whq1, bhq1, whq2, bhq2, wact, bact)


# Pure-JAX f32 reference (mirrors the PyTorch module exactly).
def reference_forward(params, x_lq, x_hq=None):
    (we, be, rbw1, rbb1, rbw2, rbb2, whq1, bhq1, whq2, bhq2, wact, bact) = params

    def rb(h, i):
        out = jax.nn.relu(h @ rbw1[i] + rbb1[i])
        out = out @ rbw2[i] + rbb2[i] + h
        return jax.nn.relu(out)

    def encode(x):
        h = jax.nn.relu(x @ we + be)
        for i in range(TOTAL_RB):
            h = rb(h, i)
        return h

    enc_lq = encode(x_lq)
    rec = jax.nn.relu(enc_lq @ whq1 + bhq1) @ whq2 + bhq2
    act = enc_lq @ wact + bact
    enc_hq = encode(x_hq) if x_hq is not None else None
    return rec, act, enc_lq, enc_hq


if __name__ == "__main__":
    key = jax.random.PRNGKey(0)
    kp, kx1, kx2 = jax.random.split(key, 3)

    params = init_params(kp)

    # --- Small, deterministic example inputs -------------------------------
    B = 8
    x_lq = jax.random.normal(kx1, (B, SENSOR_DIM), jnp.float32)
    x_hq = jax.random.normal(kx2, (B, SENSOR_DIM), jnp.float32)

    # 1) f32 path with HQ (lane-packed block-diag encoder): strict check.
    out = sensor_augmentor_forward(params, x_lq, x_hq, batch_tile=256, use_bf16=False)
    jax.block_until_ready(out)
    ref = reference_forward(params, x_lq, x_hq)
    for a, r in zip(out, ref):
        np.testing.assert_allclose(np.asarray(a), np.asarray(r), rtol=1e-5, atol=1e-5)

    # 2) f32 path without HQ: HQ branch specialized away; 128-lane padded slab.
    rec2, act2, enc2, none2 = sensor_augmentor_forward(params, x_lq, None, use_bf16=False)
    jax.block_until_ready((rec2, act2, enc2))
    assert none2 is None
    rr, ar, er, _ = reference_forward(params, x_lq, None)
    np.testing.assert_allclose(np.asarray(rec2), np.asarray(rr), rtol=1e-5, atol=1e-5)
    np.testing.assert_allclose(np.asarray(act2), np.asarray(ar), rtol=1e-5, atol=1e-5)
    np.testing.assert_allclose(np.asarray(enc2), np.asarray(er), rtol=1e-5, atol=1e-5)

    # 3) bf16 perf path with a non-multiple batch: exercises padding, the
    #    even-grid selection (multi-step grid), bf16 inputs/weights/output.
    kx3, kx4 = jax.random.split(kx2)
    B2 = 300
    xl = jax.random.normal(kx3, (B2, SENSOR_DIM), jnp.float32)
    xh = jax.random.normal(kx4, (B2, SENSOR_DIM), jnp.float32)
    out_bf = sensor_augmentor_forward(params, xl, xh, batch_tile=128, use_bf16=True)
    jax.block_until_ready(out_bf)
    ref_bf = reference_forward(params, xl, xh)
    for a, r in zip(out_bf, ref_bf):
        np.testing.assert_allclose(np.asarray(a), np.asarray(r), rtol=5e-2, atol=5e-2)

    print("KERNEL_OK")
</pallas_src>

<mosaic_0001>
module attributes {stable_mosaic.version = 11 : i64} {
  func.func @_fused_kernel(%arg0: i32, %arg1: memref<8x64xf32, #tpu.memory_space<vmem>>, %arg2: memref<64x128xf32, #tpu.memory_space<vmem>>, %arg3: memref<1x128xf32, #tpu.memory_space<vmem>>, %arg4: memref<6x128x128xf32, #tpu.memory_space<vmem>>, %arg5: memref<6x1x128xf32, #tpu.memory_space<vmem>>, %arg6: memref<64x80xf32, #tpu.memory_space<vmem>>, %arg7: memref<1x80xf32, #tpu.memory_space<vmem>>, %arg8: memref<64x32xf32, #tpu.memory_space<vmem>>, %arg9: memref<1x32xf32, #tpu.memory_space<vmem>>, %arg10: memref<8x176xf32, #tpu.memory_space<vmem>>) attributes {dimension_semantics = [#tpu.dimension_semantics<parallel>], iteration_bounds = array<i64: 1>, scalar_prefetch = 0 : i64, scratch_operands = 0 : i64, tpu.core_type = #tpu.core_type<tc>, window_params = [{transform_indices = @transform_0, window_bounds = array<i64: 8, 64>}, {pipeline_mode = #tpu.pipeline_mode<synchronous>, transform_indices = @transform_1, window_bounds = array<i64: 64, 128>}, {pipeline_mode = #tpu.pipeline_mode<synchronous>, transform_indices = @transform_2, window_bounds = array<i64: 1, 128>}, {pipeline_mode = #tpu.pipeline_mode<synchronous>, transform_indices = @transform_3, window_bounds = array<i64: 6, 128, 128>}, {pipeline_mode = #tpu.pipeline_mode<synchronous>, transform_indices = @transform_4, window_bounds = array<i64: 6, 1, 128>}, {pipeline_mode = #tpu.pipeline_mode<synchronous>, transform_indices = @transform_5, window_bounds = array<i64: 64, 80>}, {pipeline_mode = #tpu.pipeline_mode<synchronous>, transform_indices = @transform_6, window_bounds = array<i64: 1, 80>}, {pipeline_mode = #tpu.pipeline_mode<synchronous>, transform_indices = @transform_7, window_bounds = array<i64: 64, 32>}, {pipeline_mode = #tpu.pipeline_mode<synchronous>, transform_indices = @transform_8, window_bounds = array<i64: 1, 32>}, {transform_indices = @transform_9, window_bounds = array<i64: 8, 176>}]} {
    %c0 = arith.constant 0 : index
    %c0_0 = arith.constant 0 : index
    %0 = vector.load %arg1[%c0, %c0_0] : memref<8x64xf32, #tpu.memory_space<vmem>>, vector<8x64xf32>
    %c0_1 = arith.constant 0 : index
    %c0_2 = arith.constant 0 : index
    %1 = vector.load %arg2[%c0_1, %c0_2] : memref<64x128xf32, #tpu.memory_space<vmem>>, vector<64x128xf32>
    %cst = arith.constant dense<0.000000e+00> : vector<8x128xf32>
    %2 = tpu.matmul %0, %1, %cst {dimension_numbers = #tpu.dot_dimension_numbers<[1], [0], [0], [1], [0, 0, 1, 1], [], []>} : vector<8x64xf32>, vector<64x128xf32>, vector<8x128xf32> -> vector<8x128xf32>
    %c0_3 = arith.constant 0 : index
    %c0_4 = arith.constant 0 : index
    %3 = vector.load %arg3[%c0_3, %c0_4] : memref<1x128xf32, #tpu.memory_space<vmem>>, vector<1x128xf32>
    %4 = vector.broadcast %3 : vector<1x128xf32> to vector<8x128xf32>
    %5 = arith.addf %2, %4 : vector<8x128xf32>
    %cst_5 = arith.constant 0.000000e+00 : f32
    %6 = vector.broadcast %cst_5 : f32 to vector<8x128xf32>
    %7 = arith.maximumf %5, %6 : vector<8x128xf32>
    %c0_6 = arith.constant 0 : index
    %c0_7 = arith.constant 0 : index
    %c0_8 = arith.constant 0 : index
    %8 = vector.load %arg4[%c0_6, %c0_7, %c0_8] : memref<6x128x128xf32, #tpu.memory_space<vmem>>, vector<1x128x128xf32>
    %9 = vector.shape_cast %8 : vector<1x128x128xf32> to vector<128x128xf32>
    %cst_9 = arith.constant dense<0.000000e+00> : vector<8x128xf32>
    %10 = tpu.matmul %7, %9, %cst_9 {dimension_numbers = #tpu.dot_dimension_numbers<[1], [0], [0], [1], [0, 0, 1, 1], [], []>} : vector<8x128xf32>, vector<128x128xf32>, vector<8x128xf32> -> vector<8x128xf32>
    %c0_10 = arith.constant 0 : index
    %c0_11 = arith.constant 0 : index
    %c0_12 = arith.constant 0 : index
    %11 = vector.load %arg5[%c0_10, %c0_11, %c0_12] : memref<6x1x128xf32, #tpu.memory_space<vmem>>, vector<1x1x128xf32>
    %12 = vector.shape_cast %11 : vector<1x1x128xf32> to vector<1x128xf32>
    %13 = vector.broadcast %12 : vector<1x128xf32> to vector<8x128xf32>
    %14 = arith.addf %10, %13 : vector<8x128xf32>
    %cst_13 = arith.constant 0.000000e+00 : f32
    %15 = vector.broadcast %cst_13 : f32 to vector<8x128xf32>
    %16 = arith.maximumf %14, %15 : vector<8x128xf32>
    %c1 = arith.constant 1 : index
    %c0_14 = arith.constant 0 : index
    %c0_15 = arith.constant 0 : index
    %17 = vector.load %arg4[%c1, %c0_14, %c0_15] : memref<6x128x128xf32, #tpu.memory_space<vmem>>, vector<1x128x128xf32>
    %18 = vector.shape_cast %17 : vector<1x128x128xf32> to vector<128x128xf32>
    %cst_16 = arith.constant dense<0.000000e+00> : vector<8x128xf32>
    %19 = tpu.matmul %16, %18, %cst_16 {dimension_numbers = #tpu.dot_dimension_numbers<[1], [0], [0], [1], [0, 0, 1, 1], [], []>} : vector<8x128xf32>, vector<128x128xf32>, vector<8x128xf32> -> vector<8x128xf32>
    %c1_17 = arith.constant 1 : index
    %c0_18 = arith.constant 0 : index
    %c0_19 = arith.constant 0 : index
    %20 = vector.load %arg5[%c1_17, %c0_18, %c0_19] : memref<6x1x128xf32, #tpu.memory_space<vmem>>, vector<1x1x128xf32>
    %21 = vector.shape_cast %20 : vector<1x1x128xf32> to vector<1x128xf32>
    %22 = vector.broadcast %21 : vector<1x128xf32> to vector<8x128xf32>
    %23 = arith.addf %19, %22 : vector<8x128xf32>
    %24 = arith.addf %23, %7 : vector<8x128xf32>
    %cst_20 = arith.constant 0.000000e+00 : f32
    %25 = vector.broadcast %cst_20 : f32 to vector<8x128xf32>
    %26 = arith.maximumf %24, %25 : vector<8x128xf32>
    %c2 = arith.constant 2 : index
    %c0_21 = arith.constant 0 : index
    %c0_22 = arith.constant 0 : index
    %27 = vector.load %arg4[%c2, %c0_21, %c0_22] : memref<6x128x128xf32, #tpu.memory_space<vmem>>, vector<1x128x128xf32>
    %28 = vector.shape_cast %27 : vector<1x128x128xf32> to vector<128x128xf32>
    %cst_23 = arith.constant dense<0.000000e+00> : vector<8x128xf32>
    %29 = tpu.matmul %26, %28, %cst_23 {dimension_numbers = #tpu.dot_dimension_numbers<[1], [0], [0], [1], [0, 0, 1, 1], [], []>} : vector<8x128xf32>, vector<128x128xf32>, vector<8x128xf32> -> vector<8x128xf32>
    %c2_24 = arith.constant 2 : index
    %c0_25 = arith.constant 0 : index
    %c0_26 = arith.constant 0 : index
    %30 = vector.load %arg5[%c2_24, %c0_25, %c0_26] : memref<6x1x128xf32, #tpu.memory_space<vmem>>, vector<1x1x128xf32>
    %31 = vector.shape_cast %30 : vector<1x1x128xf32> to vector<1x128xf32>
    %32 = vector.broadcast %31 : vector<1x128xf32> to vector<8x128xf32>
    %33 = arith.addf %29, %32 : vector<8x128xf32>
    %cst_27 = arith.constant 0.000000e+00 : f32
    %34 = vector.broadcast %cst_27 : f32 to vector<8x128xf32>
    %35 = arith.maximumf %33, %34 : vector<8x128xf32>
    %c3 = arith.constant 3 : index
    %c0_28 = arith.constant 0 : index
    %c0_29 = arith.constant 0 : index
    %36 = vector.load %arg4[%c3, %c0_28, %c0_29] : memref<6x128x128xf32, #tpu.memory_space<vmem>>, vector<1x128x128xf32>
    %37 = vector.shape_cast %36 : vector<1x128x128xf32> to vector<128x128xf32>
    %cst_30 = arith.constant dense<0.000000e+00> : vector<8x128xf32>
    %38 = tpu.matmul %35, %37, %cst_30 {dimension_numbers = #tpu.dot_dimension_numbers<[1], [0], [0], [1], [0, 0, 1, 1], [], []>} : vector<8x128xf32>, vector<128x128xf32>, vector<8x128xf32> -> vector<8x128xf32>
    %c3_31 = arith.constant 3 : index
    %c0_32 = arith.constant 0 : index
    %c0_33 = arith.constant 0 : index
    %39 = vector.load %arg5[%c3_31, %c0_32, %c0_33] : memref<6x1x128xf32, #tpu.memory_space<vmem>>, vector<1x1x128xf32>
    %40 = vector.shape_cast %39 : vector<1x1x128xf32> to vector<1x128xf32>
    %41 = vector.broadcast %40 : vector<1x128xf32> to vector<8x128xf32>
    %42 = arith.addf %38, %41 : vector<8x128xf32>
    %43 = arith.addf %42, %26 : vector<8x128xf32>
    %cst_34 = arith.constant 0.000000e+00 : f32
    %44 = vector.broadcast %cst_34 : f32 to vector<8x128xf32>
    %45 = arith.maximumf %43, %44 : vector<8x128xf32>
    %c4 = arith.constant 4 : index
    %c0_35 = arith.constant 0 : index
    %c0_36 = arith.constant 0 : index
    %46 = vector.load %arg4[%c4, %c0_35, %c0_36] : memref<6x128x128xf32, #tpu.memory_space<vmem>>, vector<1x128x128xf32>
    %47 = vector.shape_cast %46 : vector<1x128x128xf32> to vector<128x128xf32>
    %cst_37 = arith.constant dense<0.000000e+00> : vector<8x128xf32>
    %48 = tpu.matmul %45, %47, %cst_37 {dimension_numbers = #tpu.dot_dimension_numbers<[1], [0], [0], [1], [0, 0, 1, 1], [], []>} : vector<8x128xf32>, vector<128x128xf32>, vector<8x128xf32> -> vector<8x128xf32>
    %c4_38 = arith.constant 4 : index
    %c0_39 = arith.constant 0 : index
    %c0_40 = arith.constant 0 : index
    %49 = vector.load %arg5[%c4_38, %c0_39, %c0_40] : memref<6x1x128xf32, #tpu.memory_space<vmem>>, vector<1x1x128xf32>
    %50 = vector.shape_cast %49 : vector<1x1x128xf32> to vector<1x128xf32>
    %51 = vector.broadcast %50 : vector<1x128xf32> to vector<8x128xf32>
    %52 = arith.addf %48, %51 : vector<8x128xf32>
    %cst_41 = arith.constant 0.000000e+00 : f32
    %53 = vector.broadcast %cst_41 : f32 to vector<8x128xf32>
    %54 = arith.maximumf %52, %53 : vector<8x128xf32>
    %c5 = arith.constant 5 : index
    %c0_42 = arith.constant 0 : index
    %c0_43 = arith.constant 0 : index
    %55 = vector.load %arg4[%c5, %c0_42, %c0_43] : memref<6x128x128xf32, #tpu.memory_space<vmem>>, vector<1x128x128xf32>
    %56 = vector.shape_cast %55 : vector<1x128x128xf32> to vector<128x128xf32>
    %cst_44 = arith.constant dense<0.000000e+00> : vector<8x128xf32>
    %57 = tpu.matmul %54, %56, %cst_44 {dimension_numbers = #tpu.dot_dimension_numbers<[1], [0], [0], [1], [0, 0, 1, 1], [], []>} : vector<8x128xf32>, vector<128x128xf32>, vector<8x128xf32> -> vector<8x128xf32>
    %c5_45 = arith.constant 5 : index
    %c0_46 = arith.constant 0 : index
    %c0_47 = arith.constant 0 : index
    %58 = vector.load %arg5[%c5_45, %c0_46, %c0_47] : memref<6x1x128xf32, #tpu.memory_space<vmem>>, vector<1x1x128xf32>
    %59 = vector.shape_cast %58 : vector<1x1x128xf32> to vector<1x128xf32>
    %60 = vector.broadcast %59 : vector<1x128xf32> to vector<8x128xf32>
    %61 = arith.addf %57, %60 : vector<8x128xf32>
    %62 = arith.addf %61, %45 : vector<8x128xf32>
    %cst_48 = arith.constant 0.000000e+00 : f32
    %63 = vector.broadcast %cst_48 : f32 to vector<8x128xf32>
    %64 = arith.maximumf %62, %63 : vector<8x128xf32>
    %65 = vector.extract_strided_slice %64 {offsets = [0, 0], sizes = [8, 64], strides = [1, 1]} : vector<8x128xf32> to vector<8x64xf32>
    %c0_49 = arith.constant 0 : index
    %c0_50 = arith.constant 0 : index
    %66 = vector.load %arg6[%c0_49, %c0_50] : memref<64x80xf32, #tpu.memory_space<vmem>>, vector<64x80xf32>
    %cst_51 = arith.constant dense<0.000000e+00> : vector<8x80xf32>
    %67 = tpu.matmul %65, %66, %cst_51 {dimension_numbers = #tpu.dot_dimension_numbers<[1], [0], [0], [1], [0, 0, 1, 1], [], []>} : vector<8x64xf32>, vector<64x80xf32>, vector<8x80xf32> -> vector<8x80xf32>
    %c0_52 = arith.constant 0 : index
    %c0_53 = arith.constant 0 : index
    %68 = vector.load %arg7[%c0_52, %c0_53] : memref<1x80xf32, #tpu.memory_space<vmem>>, vector<1x80xf32>
    %69 = vector.broadcast %68 : vector<1x80xf32> to vector<8x80xf32>
    %70 = arith.addf %67, %69 : vector<8x80xf32>
    %71 = vector.extract_strided_slice %70 {offsets = [0, 0], sizes = [8, 64], strides = [1, 1]} : vector<8x80xf32> to vector<8x64xf32>
    %cst_54 = arith.constant 0.000000e+00 : f32
    %72 = vector.broadcast %cst_54 : f32 to vector<8x64xf32>
    %73 = arith.maximumf %71, %72 : vector<8x64xf32>
    %74 = vector.extract_strided_slice %70 {offsets = [0, 64], sizes = [8, 16], strides = [1, 1]} : vector<8x80xf32> to vector<8x16xf32>
    %c0_55 = arith.constant 0 : index
    %c0_56 = arith.constant 0 : index
    %75 = vector.load %arg8[%c0_55, %c0_56] : memref<64x32xf32, #tpu.memory_space<vmem>>, vector<64x32xf32>
    %cst_57 = arith.constant dense<0.000000e+00> : vector<8x32xf32>
    %76 = tpu.matmul %73, %75, %cst_57 {dimension_numbers = #tpu.dot_dimension_numbers<[1], [0], [0], [1], [0, 0, 1, 1], [], []>} : vector<8x64xf32>, vector<64x32xf32>, vector<8x32xf32> -> vector<8x32xf32>
    %c0_58 = arith.constant 0 : index
    %c0_59 = arith.constant 0 : index
    %77 = vector.load %arg9[%c0_58, %c0_59] : memref<1x32xf32, #tpu.memory_space<vmem>>, vector<1x32xf32>
    %78 = vector.broadcast %77 : vector<1x32xf32> to vector<8x32xf32>
    %79 = arith.addf %76, %78 : vector<8x32xf32>
    %80 = tpu.concatenate %64, %79, %74 in 1 : vector<8x128xf32>, vector<8x32xf32>, vector<8x16xf32> -> vector<8x176xf32>
    %c0_60 = arith.constant 0 : index
    %c0_61 = arith.constant 0 : index
    %81 = vector.load %arg10[%c0_60, %c0_61] : memref<8x176xf32, #tpu.memory_space<vmem>>, vector<8x176xf32>
    tpu.vector_store %arg10[%c0_60, %c0_61], %80 {strides = array<i32>} : memref<8x176xf32, #tpu.memory_space<vmem>>, vector<8x176xf32>,
    return
  }
  func.func @transform_0(%arg0: i32) -> (i32, i32) {
    %c0_i32 = arith.constant 0 : i32
    %c0_i32_0 = arith.constant 0 : i32
    return %arg0, %c0_i32 : i32, i32
  }
  func.func @transform_1(%arg0: i32) -> (i32, i32) {
    %c0_i32 = arith.constant 0 : i32
    %c0_i32_0 = arith.constant 0 : i32
    %c0_i32_1 = arith.constant 0 : i32
    return %c0_i32, %c0_i32_0 : i32, i32
  }
  func.func @transform_2(%arg0: i32) -> (i32, i32) {
    %c0_i32 = arith.constant 0 : i32
    %c0_i32_0 = arith.constant 0 : i32
    %c0_i32_1 = arith.constant 0 : i32
    return %c0_i32, %c0_i32_0 : i32, i32
  }
  func.func @transform_3(%arg0: i32) -> (i32, i32, i32) {
    %c0_i32 = arith.constant 0 : i32
    %c0_i32_0 = arith.constant 0 : i32
    %c0_i32_1 = arith.constant 0 : i32
    %c0_i32_2 = arith.constant 0 : i32
    return %c0_i32, %c0_i32_0, %c0_i32_1 : i32, i32, i32
  }
  func.func @transform_4(%arg0: i32) -> (i32, i32, i32) {
    %c0_i32 = arith.constant 0 : i32
    %c0_i32_0 = arith.constant 0 : i32
    %c0_i32_1 = arith.constant 0 : i32
    %c0_i32_2 = arith.constant 0 : i32
    return %c0_i32, %c0_i32_0, %c0_i32_1 : i32, i32, i32
  }
  func.func @transform_5(%arg0: i32) -> (i32, i32) {
    %c0_i32 = arith.constant 0 : i32
    %c0_i32_0 = arith.constant 0 : i32
    %c0_i32_1 = arith.constant 0 : i32
    return %c0_i32, %c0_i32_0 : i32, i32
  }
  func.func @transform_6(%arg0: i32) -> (i32, i32) {
    %c0_i32 = arith.constant 0 : i32
    %c0_i32_0 = arith.constant 0 : i32
    %c0_i32_1 = arith.constant 0 : i32
    return %c0_i32, %c0_i32_0 : i32, i32
  }
  func.func @transform_7(%arg0: i32) -> (i32, i32) {
    %c0_i32 = arith.constant 0 : i32
    %c0_i32_0 = arith.constant 0 : i32
    %c0_i32_1 = arith.constant 0 : i32
    return %c0_i32, %c0_i32_0 : i32, i32
  }
  func.func @transform_8(%arg0: i32) -> (i32, i32) {
    %c0_i32 = arith.constant 0 : i32
    %c0_i32_0 = arith.constant 0 : i32
    %c0_i32_1 = arith.constant 0 : i32
    return %c0_i32, %c0_i32_0 : i32, i32
  }
  func.func @transform_9(%arg0: i32) -> (i32, i32) {
    %c0_i32 = arith.constant 0 : i32
    %c0_i32_0 = arith.constant 0 : i32
    return %arg0, %c0_i32 : i32, i32
  }
}

</mosaic_0001>

<bundles_post_ra>
// kernel: _forward_impl.1
= control target key start
LH: loop header
LB: loop body
LE: loop exit
PB: predicated region body
PF: predicated region fallthrough
CT: control target
= control target key end

     0   :  { %v1567_v0 = vmov 0.0|0.0   ;;  %vm1568_vm0 = vmmov 0   ;;  %v1569_v4 = vmov 0.0   ;;  %vm48_vm1 = vcmask 523264   ;;  %s1570_s27 = smov 96   ;;  %s2112_s1 = inlined_call_operand.vmem [shape: f32[64,128], index: 1, kind: input, shape index: {}]   ;;  %s2113_s3 = inlined_call_operand.vmem [shape: f32[6,128,128], index: 3, kind: input, shape index: {}]   ;;  %s2114_s0 = inlined_call_operand.vmem [shape: f32[8,64], index: 0, kind: input, shape index: {}]   ;;  %s2115_s2 = inlined_call_operand.vmem [shape: f32[1,128], index: 2, kind: input, shape index: {}]   ;;  %s2116_s4 = inlined_call_operand.vmem [shape: f32[6,1,128], index: 4, kind: input, shape index: {}]   ;;  %s2117_s5 = inlined_call_operand.vmem [shape: f32[64,80], index: 5, kind: input, shape index: {}]   ;;  %s2118_s7 = inlined_call_operand.vmem [shape: f32[64,32], index: 7, kind: input, shape index: {}]   ;;  %s2119_s9 = inlined_call_operand.vmem [shape: f32[8,176], index: 9, kind: output, shape index: {}]   ;;  %s2120_s6 = inlined_call_operand.vmem [shape: f32[1,80], index: 6, kind: input, shape index: {}]   ;;  %s2121_s8 = inlined_call_operand.vmem [shape: f32[1,32], index: 8, kind: input, shape index: {}]  }
   0x1   :  { %1383 = vmatprep.subr.bf16.mxu0 %v1567_v0  ;;  %v33_v1 = vld [vmem:[%s2112_s1] sm:$0xff]  ;;  %v34_v2 = vld [vmem:[%s2112_s1 + $0x8] sm:$0xff]  ;;  %v35_v3 = vld [vmem:[%s2112_s1 + $0x10] sm:$0xff]  ;;  %1132 = vmatprep.mubr.msk.f32.mxu0 %vm1568_vm0, %v1569_v4  ;;  %vm881_vm2 = vcmask 261120   ;;  %vm884_vm3 = vcmask 392192  }
   0x2   :  { %v1384_v5 = vpack.c.bf16 %v34_v2, %v33_v1  ;;  %v36_v6 = vld [vmem:[%s2112_s1 + $0x18] sm:$0xff]  ;;  %1395 = vmatprep.subr.bf16.mxu1 %v1567_v0  ;;  %1167 = vmatprep.mubr.msk.f32.mxu1 %vm1568_vm0, %v1569_v4  ;;  %v123_v8 = vld [vmem:[%s2113_s3] sm:$0xff]  ;;  %v124_v9 = vld [vmem:[%s2113_s3 + $0x8] sm:$0xff] }
   0x3   :  { %v1387_v7 = vpack.c.bf16 %v36_v6, %v35_v3  ;;  %v125_v10 = vld [vmem:[%s2113_s3 + $0x10] sm:$0xff]  ;;  %v37_v11 = vld [vmem:[%s2112_s1 + $0x20] sm:$0xff]  ;;  %v38_v12 = vld [vmem:[%s2112_s1 + $0x28] sm:$0xff]  ;;  %v1396_v13 = vpack.c.bf16 %v124_v9, %v123_v8 }
   0x4   :  { %1385 = vmatpush3.bf16.msra.mxu0 %v1384_v5  ;;  %v126_v14 = vld [vmem:[%s2113_s3 + $0x18] sm:$0xff]  ;;  %v1390_v16 = vpack.c.bf16 %v38_v12, %v37_v11  ;;  %v127_v17 = vld [vmem:[%s2113_s3 + $0x20] sm:$0xff]  ;;  %v128_v18 = vld [vmem:[%s2113_s3 + $0x28] sm:$0xff] }
   0x5   :  { %1386 = vmatprep.subr.bf16.mxu0 %v1567_v0  ;;  %1397 = vmatpush3.bf16.msra.mxu1 %v1396_v13  ;;  %v1399_v15 = vpack.c.bf16 %v126_v14, %v125_v10  ;;  %v39_v19 = vld [vmem:[%s2112_s1 + $0x30] sm:$0xff]  ;;  %v40_v20 = vld [vmem:[%s2112_s1 + $0x38] sm:$0xff]  ;;  %v1402_v21 = vpack.c.bf16 %v128_v18, %v127_v17  ;;  %v32_v26 = vld [vmem:[%s2114_s0] sm:$0xff] }
   0x6   :  { %1398 = vmatprep.subr.bf16.mxu1 %v1567_v0  ;;  %v1393_v22 = vpack.c.bf16 %v40_v20, %v39_v19  ;;  %v129_v23 = vld [vmem:[%s2113_s3 + $0x30] sm:$0xff]  ;;  %v130_v24 = vld [vmem:[%s2113_s3 + $0x38] sm:$0xff]  ;;  %v131_v27 = vld [vmem:[%s2113_s3 + $0x40] sm:$0xff] }
   0x7   :  { %v1405_v25 = vpack.c.bf16 %v130_v24, %v129_v23  ;;  %v132_v28 = vld [vmem:[%s2113_s3 + $0x48] sm:$0xff]  ;;  %v133_v30 = vld [vmem:[%s2113_s3 + $0x50] sm:$0xff]  ;;  %v134_v31 = vld [vmem:[%s2113_s3 + $0x58] sm:$0xff] }
   0x8   :  { %1388 = vmatpush3.bf16.msra.mxu0 %v1387_v7  ;;  %v1408_v29 = vpack.c.bf16 %v132_v28, %v131_v27  ;;  %v1411_v32 = vpack.c.bf16 %v134_v31, %v133_v30  ;;  %v135_v33 = vld [vmem:[%s2113_s3 + $0x60] sm:$0xff]  ;;  %v136_v34 = vld [vmem:[%s2113_s3 + $0x68] sm:$0xff]  ;;  %v137_v36 = vld [vmem:[%s2113_s3 + $0x70] sm:$0xff] }
   0x9   :  { %1389 = vmatprep.subr.bf16.mxu0 %v1567_v0  ;;  %1400 = vmatpush3.bf16.msra.mxu1 %v1399_v15  ;;  %v1414_v35 = vpack.c.bf16 %v136_v34, %v135_v33  ;;  %v138_v37 = vld [vmem:[%s2113_s3 + $0x78] sm:$0xff]  ;;  %v893_v39 = vld [vmem:[%s2113_s3 + $0x80] sm:$0xff]  ;;  %v894_v40 = vld [vmem:[%s2113_s3 + $0x88] sm:$0xff] }
   0xa   :  { %1401 = vmatprep.subr.bf16.mxu1 %v1567_v0  ;;  %v1417_v38 = vpack.c.bf16 %v138_v37, %v137_v36  ;;  %v895_v41 = vld [vmem:[%s2113_s3 + $0x90] sm:$0xff]  ;;  %v1420_v42 = vpack.c.bf16 %v894_v40, %v893_v39  ;;  %v896_v43 = vld [vmem:[%s2113_s3 + $0x98] sm:$0xff]  ;;  %v897_v45 = vld [vmem:[%s2113_s3 + $0xa0] sm:$0xff] }
   0xb   :  { %v1423_v44 = vpack.c.bf16 %v896_v43, %v895_v41  ;;  %v898_v46 = vld [vmem:[%s2113_s3 + $0xa8] sm:$0xff]  ;;  %v899_v48 = vld [vmem:[%s2113_s3 + $0xb0] sm:$0xff]  ;;  %v900_v49 = vld [vmem:[%s2113_s3 + $0xb8] sm:$0xff] }
   0xc   :  { %1391 = vmatpush3.bf16.msra.mxu0 %v1390_v16  ;;  %v1426_v47 = vpack.c.bf16 %v898_v46, %v897_v45  ;;  %v1429_v50 = vpack.c.bf16 %v900_v49, %v899_v48  ;;  %v901_v51 = vld [vmem:[%s2113_s3 + $0xc0] sm:$0xff]  ;;  %v902_v52 = vld [vmem:[%s2113_s3 + $0xc8] sm:$0xff]  ;;  %v903_v54 = vld [vmem:[%s2113_s3 + $0xd0] sm:$0xff] }
   0xd   :  { %1392 = vmatprep.subr.bf16.mxu0 %v1567_v0  ;;  %1403 = vmatpush3.bf16.msra.mxu1 %v1402_v21  ;;  %v1432_v53 = vpack.c.bf16 %v902_v52, %v901_v51  ;;  %v904_v55 = vld [vmem:[%s2113_s3 + $0xd8] sm:$0xff]  ;;  %v905_v57 = vld [vmem:[%s2113_s3 + $0xe0] sm:$0xff]  ;;  %v906_v58 = vld [vmem:[%s2113_s3 + $0xe8] sm:$0xff] }
   0xe   :  { %1404 = vmatprep.subr.bf16.mxu1 %v1567_v0  ;;  %v1435_v56 = vpack.c.bf16 %v904_v55, %v903_v54  ;;  %v1438_v59 = vpack.c.bf16 %v906_v58, %v905_v57  ;;  %v890_v60 = vld [vmem:[%s2115_s2] ss:$0 sm:$0xff]  ;;  %v907_v2 = vld [vmem:[%s2113_s3 + $0xf0] sm:$0xff]  ;;  %v908_v3 = vld [vmem:[%s2113_s3 + $0xf8] sm:$0xff] }
   0xf   :  { %v1441_v5 = vpack.c.bf16 %v908_v3, %v907_v2  ;;  %v911_v6 = vld [vmem:[%s2113_s3 + $0x100] sm:$0xff]  ;;  %v912_v7 = vld [vmem:[%s2113_s3 + $0x108] sm:$0xff]  ;;  %v913_v8 = vld [vmem:[%s2113_s3 + $0x110] sm:$0xff] }
  0x10   :  { %1394 = vmatpush3.bf16.msra.mxu0 %v1393_v22  ;;  %v1444_v9 = vpack.c.bf16 %v912_v7, %v911_v6  ;;  %v914_v10 = vld [vmem:[%s2113_s3 + $0x118] sm:$0xff]  ;;  %v915_v12 = vld [vmem:[%s2113_s3 + $0x120] sm:$0xff]  ;;  %v916_v13 = vld [vmem:[%s2113_s3 + $0x128] sm:$0xff] }
  0x11   :  { %1419 = vmatprep.subr.bf16.mxu0 %v1567_v0  ;;  %1406 = vmatpush3.bf16.msra.mxu1 %v1405_v25  ;;  %v1447_v11 = vpack.c.bf16 %v914_v10, %v913_v8  ;;  %v1450_v14 = vpack.c.bf16 %v916_v13, %v915_v12  ;;  %v917_v15 = vld [vmem:[%s2113_s3 + $0x130] sm:$0xff]  ;;  %v918_v16 = vld [vmem:[%s2113_s3 + $0x138] sm:$0xff]  ;;  %v919_v18 = vld [vmem:[%s2113_s3 + $0x140] sm:$0xff] }
  0x12   :  { %1407 = vmatprep.subr.bf16.mxu1 %v1567_v0  ;;  %v1453_v17 = vpack.c.bf16 %v918_v16, %v917_v15  ;;  %v920_v19 = vld [vmem:[%s2113_s3 + $0x148] sm:$0xff]  ;;  %v921_v21 = vld [vmem:[%s2113_s3 + $0x150] sm:$0xff]  ;;  %v922_v22 = vld [vmem:[%s2113_s3 + $0x158] sm:$0xff] }
  0x13   :  { %1133 = vmatmul.mubr.msk.f32.vlgmr.msra.gmra.mrb[0].mxu0 %vm48_vm1, %v32_v26  ;;  %v1456_v20 = vpack.c.bf16 %v920_v19, %v919_v18  ;;  %v1459_v23 = vpack.c.bf16 %v922_v22, %v921_v21  ;;  %v892_v24 = vld [vmem:[%s2116_s4] ss:$0 sm:$0xff]  ;;  %v924_v30 = vld [vmem:[%s2113_s3 + $0x168] sm:$0xff]  ;;  %v926_v33 = vld [vmem:[%s2113_s3 + $0x178] sm:$0xff] }
  0x14   :  { %1202 = vmatprep.mubr.msk.f32.mxu0 %vm1568_vm0, %v1569_v4  ;;  %1421 = vmatpush3.bf16.msra.mxu0 %v1420_v42  ;;  %v930_v36 = vld [vmem:[%s2113_s3 + $0x188] sm:$0xff]  ;;  %v931_v37 = vld [vmem:[%s2113_s3 + $0x190] sm:$0xff]  ;;  %v932_v39 = vld [vmem:[%s2113_s3 + $0x198] sm:$0xff] }
  0x15   :  { %1409 = vmatpush3.bf16.msra.mxu1 %v1408_v29  ;;  %1422 = vmatprep.subr.bf16.mxu0 %v1567_v0  ;;  %v923_v29 = vld [vmem:[%s2113_s3 + $0x160] sm:$0xff]  ;;  %v1471_v40 = vpack.c.bf16 %v932_v39, %v931_v37  ;;  %v934_v42 = vld [vmem:[%s2113_s3 + $0x1a8] sm:$0xff]  ;;  %v936_v45 = vld [vmem:[%s2113_s3 + $0x1b8] sm:$0xff] }
  0x16   :  { %1410 = vmatprep.subr.bf16.mxu1 %v1567_v0  ;;  %v1462_v31 = vpack.c.bf16 %v924_v30, %v923_v29  ;;  %v933_v41 = vld [vmem:[%s2113_s3 + $0x1a0] sm:$0xff]  ;;  %v938_v48 = vld [vmem:[%s2113_s3 + $0x1c8] sm:$0xff]  ;;  %v940_v51 = vld [vmem:[%s2113_s3 + $0x1d8] sm:$0xff] }
  0x17   :  { %v1474_v43 = vpack.c.bf16 %v934_v42, %v933_v41  ;;  %v942_v54 = vld [vmem:[%s2113_s3 + $0x1e8] sm:$0xff]  ;;  %v944_v2 = vld [vmem:[%s2113_s3 + $0x1f8] sm:$0xff]  ;;  %v953_v12 = vld [vmem:[%s2113_s3 + $0x230] sm:$0xff] }
  0x18   :  { %1424 = vmatpush3.bf16.msra.mxu0 %v1423_v44  ;;  %v935_v44 = vld [vmem:[%s2113_s3 + $0x1b0] sm:$0xff]  ;;  %v950_v7 = vld [vmem:[%s2113_s3 + $0x218] sm:$0xff]  ;;  %v952_v10 = vld [vmem:[%s2113_s3 + $0x228] sm:$0xff] }
  0x19   :  { %1412 = vmatpush3.bf16.msra.mxu1 %v1411_v32  ;;  %1425 = vmatprep.subr.bf16.mxu0 %v1567_v0  ;;  %v925_v32 = vld [vmem:[%s2113_s3 + $0x170] sm:$0xff]  ;;  %v1477_v46 = vpack.c.bf16 %v936_v45, %v935_v44  ;;  %v954_v13 = vld [vmem:[%s2113_s3 + $0x238] sm:$0xff]  ;;  %v955_v15 = vld [vmem:[%s2113_s3 + $0x240] sm:$0xff] }
  0x1a   :  { %1413 = vmatprep.subr.bf16.mxu1 %v1567_v0  ;;  %v1465_v34 = vpack.c.bf16 %v926_v33, %v925_v32  ;;  %v956_v16 = vld [vmem:[%s2113_s3 + $0x248] sm:$0xff]  ;;  %v957_v18 = vld [vmem:[%s2113_s3 + $0x250] sm:$0xff]  ;;  %v958_v19 = vld [vmem:[%s2113_s3 + $0x258] sm:$0xff] }
  0x1b   :  { %v928_v21 = vld [vmem:[%s2116_s4 + $0x2] ss:$0 sm:$0xff]  ;;  %v961_v29 = vld [vmem:[%s2113_s3 + $0x270] sm:$0xff]  ;;  %v962_v30 = vld [vmem:[%s2113_s3 + $0x278] sm:$0xff] }
  0x1c   :  { %1427 = vmatpush3.bf16.msra.mxu0 %v1426_v47  ;;  %v937_v47 = vld [vmem:[%s2113_s3 + $0x1c0] sm:$0xff]  ;;  %v966_v33 = vld [vmem:[%s2113_s3 + $0x288] sm:$0xff]  ;;  %v971_v41 = vld [vmem:[%s2113_s3 + $0x2b0] sm:$0xff] }
  0x1d   :  { %1415 = vmatpush3.bf16.msra.mxu1 %v1414_v35  ;;  %1428 = vmatprep.subr.bf16.mxu0 %v1567_v0  ;;  %v929_v35 = vld [vmem:[%s2113_s3 + $0x180] sm:$0xff]  ;;  %v1480_v49 = vpack.c.bf16 %v938_v48, %v937_v47  ;;  %v970_v39 = vld [vmem:[%s2113_s3 + $0x2a8] sm:$0xff]  ;;  %v972_v42 = vld [vmem:[%s2113_s3 + $0x2b8] sm:$0xff] }
  0x1e   :  { %1416 = vmatprep.subr.bf16.mxu1 %v1567_v0  ;;  %v965_v32 = vld [vmem:[%s2113_s3 + $0x280] sm:$0xff]  ;;  %v974_v45 = vld [vmem:[%s2113_s3 + $0x2c8] sm:$0xff]  ;;  %v975_v47 = vld [vmem:[%s2113_s3 + $0x2d0] sm:$0xff] }
  0x1f   :  { %v973_v44 = vld [vmem:[%s2113_s3 + $0x2c0] sm:$0xff]  ;;  %v976_v48 = vld [vmem:[%s2113_s3 + $0x2d8] sm:$0xff] }
  0x20   :  { %1430 = vmatpush3.bf16.msra.mxu0 %v1429_v50  ;;  %v939_v50 = vld [vmem:[%s2113_s3 + $0x1d0] sm:$0xff] }
  0x21   :  { %1418 = vmatpush3.bf16.msra.mxu1 %v1417_v38  ;;  %1431 = vmatprep.subr.bf16.mxu0 %v1567_v0  ;;  %v1468_v38 = vpack.c.bf16 %v930_v36, %v929_v35  ;;  %v1483_v52 = vpack.c.bf16 %v940_v51, %v939_v50  ;;  %v1516_v35 = vpack.c.bf16 %v966_v33, %v965_v32  ;;  %v968_v36 = vld [vmem:[%s2113_s3 + $0x298] sm:$0xff]  ;;  %v977_v50 = vld [vmem:[%s2113_s3 + $0x2e0] sm:$0xff]  ;;  %v978_v51 = vld [vmem:[%s2113_s3 + $0x2e8] sm:$0xff] }
  0x22   :  { %1443 = vmatprep.subr.bf16.mxu1 %v1567_v0  ;;  %v983_v33 = vld [vmem:[%s2120_s6] ss:$0 sm:$0xff] }
  0x24   :  { %1433 = vmatpush3.bf16.msra.mxu0 %v1432_v53  ;;  %v941_v53 = vld [vmem:[%s2113_s3 + $0x1e0] sm:$0xff] }
  0x25   :  { %1434 = vmatprep.subr.bf16.mxu0 %v1567_v0  ;;  %v1486_v55 = vpack.c.bf16 %v942_v54, %v941_v53  ;;  %v946_v53 = vld [vmem:[%s2116_s4 + $0x3] ss:$0 sm:$0xff] }
  0x28   :  { %1436 = vmatpush3.bf16.msra.mxu0 %v1435_v56  ;;  %v910_v56 = vld [vmem:[%s2116_s4 + $0x1] ss:$0 sm:$0xff] }
  0x29   :  { %1437 = vmatprep.subr.bf16.mxu0 %v1567_v0 }
  0x2c   :  { %1439 = vmatpush3.bf16.msra.mxu0 %v1438_v59 }
  0x2d   :  { %1440 = vmatprep.subr.bf16.mxu0 %v1567_v0 }
  0x30   :  { %1442 = vmatpush3.bf16.msra.mxu0 %v1441_v5  ;;  %v949_v5 = vld [vmem:[%s2113_s3 + $0x210] sm:$0xff] }
  0x31   :  { %1467 = vmatprep.subr.bf16.mxu0 %v1567_v0  ;;  %v1495_v8 = vpack.c.bf16 %v950_v7, %v949_v5 }
  0xe6   :  { %v118_v61 = vpop.f32.mrb[0].mxu0 }
  0xe7   :  { %v1769_v62 = vadd.f32 %v890_v60, %v118_v61  ;;  %v1134_v63 = vpop.f32.mrb[1].mxu0 }
  0xe8   :  { %v943_v63 = vld [vmem:[%s2113_s3 + $0x1f0] sm:$0xff] }
  0xe9   :  { %v122_v1 = vmax.f32 %v1769_v62, 0.0  ;;  %v1489_v3 = vpack.c.bf16 %v944_v2, %v943_v63  ;;  %v947_v62 = vld [vmem:[%s2113_s3 + $0x200] sm:$0xff]  ;;  %v980_v63 = vld [vmem:[%s2113_s3 + $0x2f8] sm:$0xff] }
  0xeb   :  { %1168 = vmatmul.mubr.f32.vlgmr.msra.gmra.mrb[0].mxu1 %v122_v1 }
  0xec   :  { %1237 = vmatprep.mubr.msk.f32.mxu1 %vm1568_vm0, %v1569_v4  ;;  %1445 = vmatpush3.bf16.msra.mxu1 %v1444_v9  ;;  %v951_v9 = vld [vmem:[%s2113_s3 + $0x220] sm:$0xff] }
  0xed   :  { %1446 = vmatprep.subr.bf16.mxu1 %v1567_v0 }
  0xf0   :  { %1448 = vmatpush3.bf16.msra.mxu1 %v1447_v11  ;;  %v1498_v11 = vpack.c.bf16 %v952_v10, %v951_v9 }
  0xf1   :  { %1449 = vmatprep.subr.bf16.mxu1 %v1567_v0 }
  0xf4   :  { %1451 = vmatpush3.bf16.msra.mxu1 %v1450_v14  ;;  %v1501_v14 = vpack.c.bf16 %v954_v13, %v953_v12  ;;  %v705_v12 = vld [vmem:[%s2117_s5 + $0x28] sm:$0xff] }
  0xf5   :  { %1452 = vmatprep.subr.bf16.mxu1 %v1567_v0 }
  0xf8   :  { %1454 = vmatpush3.bf16.msra.mxu1 %v1453_v17  ;;  %v1504_v17 = vpack.c.bf16 %v956_v16, %v955_v15  ;;  %v789_v16 = vld [vmem:[%s2118_s7] sm:$0xff] }
  0xf9   :  { %1455 = vmatprep.subr.bf16.mxu1 %v1567_v0 }
  0xfc   :  { %1457 = vmatpush3.bf16.msra.mxu1 %v1456_v20  ;;  %v1507_v20 = vpack.c.bf16 %v958_v19, %v957_v18  ;;  %v791_v18 = vld [vmem:[%s2118_s7 + $0x10] sm:$0xff] }
  0xfd   :  { %1458 = vmatprep.subr.bf16.mxu1 %v1567_v0 }
 0x100   :  { %1460 = vmatpush3.bf16.msra.mxu1 %v1459_v23 }
 0x101   :  { %1461 = vmatprep.subr.bf16.mxu1 %v1567_v0 }
 0x104   :  { %1463 = vmatpush3.bf16.msra.mxu1 %v1462_v31  ;;  %v1513_v31 = vpack.c.bf16 %v962_v30, %v961_v29 }
 0x105   :  { %1464 = vmatprep.subr.bf16.mxu1 %v1567_v0 }
 0x108   :  { %1466 = vmatpush3.bf16.msra.mxu1 %v1465_v34  ;;  %v967_v34 = vld [vmem:[%s2113_s3 + $0x290] sm:$0xff] }
 0x109   :  { %1491 = vmatprep.subr.bf16.mxu1 %v1567_v0  ;;  %v1519_v37 = vpack.c.bf16 %v968_v36, %v967_v34 }
 0x1be   :  { %v212_v25 = vpop.f32.mrb[0].mxu1 }
 0x1bf   :  { %v213_v26 = vadd.f32 %v892_v24, %v212_v25  ;;  %v1169_v27 = vpop.f32.mrb[1].mxu1 }
 0x1c0   :  { %v960_v27 = vld [vmem:[%s2113_s3 + $0x268] sm:$0xff] }
 0x1c1   :  { %v216_v28 = vmax.f32 %v213_v26, 0.0  ;;  %v959_v26 = vld [vmem:[%s2113_s3 + $0x260] sm:$0xff] }
 0x1c3   :  { %1203 = vmatmul.mubr.f32.vlgmr.msra.gmra.mrb[2].mxu0 %v216_v28  ;;  %v1510_v28 = vpack.c.bf16 %v960_v27, %v959_v26 }
 0x1c4   :  { %1272 = vmatprep.mubr.msk.f32.mxu0 %vm1568_vm0, %v1569_v4  ;;  %1469 = vmatpush3.bf16.msra.mxu0 %v1468_v38  ;;  %v969_v38 = vld [vmem:[%s2113_s3 + $0x2a0] sm:$0xff] }
 0x1c5   :  { %1470 = vmatprep.subr.bf16.mxu0 %v1567_v0 }
 0x1c8   :  { %1472 = vmatpush3.bf16.msra.mxu0 %v1471_v40  ;;  %v1522_v40 = vpack.c.bf16 %v970_v39, %v969_v38  ;;  %v985_v38 = vld [vmem:[%s2121_s8] ss:$0 sm:$0xff] }
 0x1c9   :  { %1473 = vmatprep.subr.bf16.mxu0 %v1567_v0 }
 0x1cc   :  { %1475 = vmatpush3.bf16.msra.mxu0 %v1474_v43  ;;  %v1525_v43 = vpack.c.bf16 %v972_v42, %v971_v41 }
 0x1cd   :  { %1476 = vmatprep.subr.bf16.mxu0 %v1567_v0 }
 0x1d0   :  { %1478 = vmatpush3.bf16.msra.mxu0 %v1477_v46  ;;  %v1528_v46 = vpack.c.bf16 %v974_v45, %v973_v44 }
 0x1d1   :  { %1479 = vmatprep.subr.bf16.mxu0 %v1567_v0 }
 0x1d4   :  { %1481 = vmatpush3.bf16.msra.mxu0 %v1480_v49  ;;  %v1531_v49 = vpack.c.bf16 %v976_v48, %v975_v47 }
 0x1d5   :  { %1482 = vmatprep.subr.bf16.mxu0 %v1567_v0 }
 0x1d8   :  { %1484 = vmatpush3.bf16.msra.mxu0 %v1483_v52  ;;  %v1534_v52 = vpack.c.bf16 %v978_v51, %v977_v50 }
 0x1d9   :  { %1485 = vmatprep.subr.bf16.mxu0 %v1567_v0 }
 0x1dc   :  { %1487 = vmatpush3.bf16.msra.mxu0 %v1486_v55 }
 0x1dd   :  { %1488 = vmatprep.subr.bf16.mxu0 %v1567_v0 }
 0x1e0   :  { %1490 = vmatpush3.bf16.msra.mxu0 %v1489_v3  ;;  %v702_v3 = vld [vmem:[%s2117_s5 + $0x10] sm:$0xff] }
 0x1e1   :  { %1515 = vmatprep.subr.bf16.mxu0 %v1567_v0 }
 0x296   :  { %v308_v57 = vpop.f32.mrb[2].mxu0 }
 0x297   :  { %v309_v58 = vadd.f32 %v910_v56, %v308_v57  ;;  %v1204_v59 = vpop.f32.mrb[3].mxu0 }
 0x298   :  { %v979_v59 = vld [vmem:[%s2113_s3 + $0x2f0] sm:$0xff] }
 0x299   :  { %v1898_v60 = vadd.f32 %v309_v58, %v122_v1  ;;  %v948_v1 = vld [vmem:[%s2113_s3 + $0x208] sm:$0xff]  ;;  %v1537_v2 = vpack.c.bf16 %v980_v63, %v979_v59 }
 0x29a   :  { %v1492_v6 = vpack.c.bf16 %v948_v1, %v947_v62  ;;  %v703_v1 = vld [vmem:[%s2117_s5 + $0x18] sm:$0xff] }
 0x29b   :  { %v313_v61 = vmax.f32 %v1898_v60, 0.0  ;;  %v700_v60 = vld [vmem:[%s2117_s5] sm:$0xff]  ;;  %v1543_v5 = vpack.c.bf16 %v703_v1, %v702_v3 }
 0x29d   :  { %1238 = vmatmul.mubr.f32.vlgmr.msra.gmra.mrb[2].mxu1 %v313_v61 }
 0x29e   :  { %1307 = vmatprep.mubr.msk.f32.mxu1 %vm1568_vm0, %v1569_v4  ;;  %1493 = vmatpush3.bf16.msra.mxu1 %v1492_v6  ;;  %v964_v6 = vld [vmem:[%s2116_s4 + $0x4] ss:$0 sm:$0xff] }
 0x29f   :  { %1494 = vmatprep.subr.bf16.mxu1 %v1567_v0 }
 0x2a2   :  { %1496 = vmatpush3.bf16.msra.mxu1 %v1495_v8 }
 0x2a3   :  { %1497 = vmatprep.subr.bf16.mxu1 %v1567_v0 }
 0x2a6   :  { %1499 = vmatpush3.bf16.msra.mxu1 %v1498_v11  ;;  %v704_v11 = vld [vmem:[%s2117_s5 + $0x20] sm:$0xff] }
 0x2a7   :  { %1500 = vmatprep.subr.bf16.mxu1 %v1567_v0  ;;  %v1546_v13 = vpack.c.bf16 %v705_v12, %v704_v11 }
 0x2aa   :  { %1502 = vmatpush3.bf16.msra.mxu1 %v1501_v14  ;;  %v706_v14 = vld [vmem:[%s2117_s5 + $0x30] sm:$0xff] }
 0x2ab   :  { %1503 = vmatprep.subr.bf16.mxu1 %v1567_v0 }
 0x2ae   :  { %1505 = vmatpush3.bf16.msra.mxu1 %v1504_v17  ;;  %v790_v17 = vld [vmem:[%s2118_s7 + $0x8] sm:$0xff] }
 0x2af   :  { %1506 = vmatprep.subr.bf16.mxu1 %v1567_v0  ;;  %v1552_v19 = vpack.c.bf16 %v790_v17, %v789_v16 }
 0x2b2   :  { %1508 = vmatpush3.bf16.msra.mxu1 %v1507_v20  ;;  %v792_v20 = vld [vmem:[%s2118_s7 + $0x18] sm:$0xff] }
 0x2b3   :  { %1509 = vmatprep.subr.bf16.mxu1 %v1567_v0 }
 0x2b6   :  { %1511 = vmatpush3.bf16.msra.mxu1 %v1510_v28 }
 0x2b7   :  { %1512 = vmatprep.subr.bf16.mxu1 %v1567_v0 }
 0x2ba   :  { %1514 = vmatpush3.bf16.msra.mxu1 %v1513_v31  ;;  %v795_v31 = vld [vmem:[%s2118_s7 + $0x30] sm:$0xff] }
 0x2bb   :  { %1539 = vmatprep.subr.bf16.mxu1 %v1567_v0 }
 0x370   :  { %v405_v22 = vpop.f32.mrb[2].mxu1 }
 0x371   :  { %v406_v23 = vadd.f32 %v928_v21, %v405_v22  ;;  %v1239_v24 = vpop.f32.mrb[3].mxu1  ;;  %v1555_v21 = vpack.c.bf16 %v792_v20, %v791_v18  ;;  %v793_v22 = vld [vmem:[%s2118_s7 + $0x20] sm:$0xff] }
 0x373   :  { %v409_v25 = vmax.f32 %v406_v23, 0.0  ;;  %v794_v23 = vld [vmem:[%s2118_s7 + $0x28] sm:$0xff] }
 0x374   :  { %v1558_v24 = vpack.c.bf16 %v794_v23, %v793_v22 }
 0x375   :  { %1273 = vmatmul.mubr.f32.vlgmr.msra.gmra.mrb[4].mxu0 %v409_v25  ;;  %v982_v25 = vld [vmem:[%s2116_s4 + $0x5] ss:$0 sm:$0xff] }
 0x376   :  { %1342 = vmatprep.mubr.msk.f32.mxu0 %vm1568_vm0, %v1569_v4  ;;  %1517 = vmatpush3.bf16.msra.mxu0 %v1516_v35 }
 0x377   :  { %1518 = vmatprep.subr.bf16.mxu0 %v1567_v0 }
 0x37a   :  { %1520 = vmatpush3.bf16.msra.mxu0 %v1519_v37 }
 0x37b   :  { %1521 = vmatprep.subr.bf16.mxu0 %v1567_v0 }
 0x37e   :  { %1523 = vmatpush3.bf16.msra.mxu0 %v1522_v40 }
 0x37f   :  { %1524 = vmatprep.subr.bf16.mxu0 %v1567_v0 }
 0x382   :  { %1526 = vmatpush3.bf16.msra.mxu0 %v1525_v43 }
 0x383   :  { %1527 = vmatprep.subr.bf16.mxu0 %v1567_v0 }
 0x386   :  { %1529 = vmatpush3.bf16.msra.mxu0 %v1528_v46 }
 0x387   :  { %1530 = vmatprep.subr.bf16.mxu0 %v1567_v0 }
 0x38a   :  { %1532 = vmatpush3.bf16.msra.mxu0 %v1531_v49 }
 0x38b   :  { %1533 = vmatprep.subr.bf16.mxu0 %v1567_v0 }
 0x38e   :  { %1535 = vmatpush3.bf16.msra.mxu0 %v1534_v52 }
 0x38f   :  { %1536 = vmatprep.subr.bf16.mxu0 %v1567_v0 }
 0x392   :  { %1538 = vmatpush3.bf16.msra.mxu0 %v1537_v2 }
 0x393   :  { %1551 = vmatprep.subr.bf16.mxu0 %v1567_v0 }
 0x448   :  { %v501_v54 = vpop.f32.mrb[4].mxu0 }
 0x449   :  { %v502_v55 = vadd.f32 %v946_v53, %v501_v54  ;;  %v1274_v56 = vpop.f32.mrb[5].mxu0 }
 0x44b   :  { %v505_v57 = vadd.f32 %v502_v55, %v313_v61  ;;  %v701_v61 = vld [vmem:[%s2117_s5 + $0x8] sm:$0xff] }
 0x44c   :  { %v1540_v62 = vpack.c.bf16 %v701_v61, %v700_v60 }
 0x44d   :  { %v506_v58 = vmax.f32 %v505_v57, 0.0 }
 0x44f   :  { %1308 = vmatmul.mubr.f32.vlgmr.msra.gmra.mrb[4].mxu1 %v506_v58 }
 0x450   :  { %1361 = vmatprep.mubr.msk.f32.mxu1 %vm1568_vm0, %v1569_v4  ;;  %1541 = vmatpush3.bf16.msra.mxu1 %v1540_v62 }
 0x451   :  { %1542 = vmatprep.subr.bf16.mxu1 %v1567_v0 }
 0x454   :  { %1544 = vmatpush3.bf16.msra.mxu1 %v1543_v5 }
 0x455   :  { %1545 = vmatprep.subr.bf16.mxu1 %v1567_v0 }
 0x458   :  { %1547 = vmatpush3.bf16.msra.mxu1 %v1546_v13 }
 0x459   :  { %1548 = vmatprep.subr.bf16.mxu1 %v1567_v0 }
 0x522   :  { %v598_v7 = vpop.f32.mrb[4].mxu1 }
 0x523   :  { %v599_v8 = vadd.f32 %v964_v6, %v598_v7  ;;  %v1309_v9 = vpop.f32.mrb[5].mxu1 }
 0x525   :  { %v602_v10 = vmax.f32 %v599_v8, 0.0 }
 0x527   :  { %1343 = vmatmul.mubr.f32.vlgmr.msra.gmra.mrb[6].mxu0 %v602_v10 }
 0x528   :  { %1380 = vmatprep.mubr.msk.f32.mxu0 %vm1568_vm0, %v1569_v4  ;;  %v707_v4 = vld [vmem:[%s2117_s5 + $0x38] sm:$0xff]  ;;  %1553 = vmatpush3.bf16.msra.mxu0 %v1552_v19 }
 0x529   :  { %v1549_v15 = vpack.c.bf16 %v707_v4, %v706_v14  ;;  %1554 = vmatprep.subr.bf16.mxu0 %v1567_v0 }
 0x52b   :  { %1550 = vmatpush3.bf16.msra.mxu1 %v1549_v15 }
 0x52c   :  { %1556 = vmatpush3.bf16.msra.mxu0 %v1555_v21 }
 0x52d   :  { %1557 = vmatprep.subr.bf16.mxu0 %v1567_v0 }
 0x530   :  { %1559 = vmatpush3.bf16.msra.mxu0 %v1558_v24 }
 0x531   :  { %1560 = vmatprep.subr.bf16.mxu0 %v1567_v0  ;;  %v796_v0 = vld [vmem:[%s2118_s7 + $0x38] sm:$0xff] }
 0x532   :  { %v1561_v32 = vpack.c.bf16 %v796_v0, %v795_v31 }
 0x534   :  { %1562 = vmatpush3.bf16.msra.mxu0 %v1561_v32 }
 0x5fa   :  { %v694_v26 = vpop.f32.mrb[6].mxu0 }
 0x5fb   :  { %v695_v27 = vadd.f32 %v982_v25, %v694_v26  ;;  %v1344_v28 = vpop.f32.mrb[7].mxu0 }
 0x5fd   :  { %v698_v29 = vadd.f32 %v695_v27, %v506_v58 }
 0x5ff   :  { %v699_v30 = vmax.f32 %v698_v29, 0.0 }
 0x601   :  { %883 = vst [vmem:[%s2119_s9] sm:$0xff] %v699_v30  ;;  %1362 = vmatmul.mubr.msk.f32.vlgmr.msra.gmra.mrb[6].mxu1 %vm48_vm1, %v699_v30 }
 0x6d4   :  { %v784_v34 = vpop.f32.mrb[6].mxu1 }
 0x6d5   :  { %v785_v35 = vadd.f32 %v983_v33, %v784_v34  ;;  %v1363_v36 = vpop.f32.mrb[7].mxu1 }
 0x6d7   :  { %v788_v37 = vmax.f32 %v785_v35, 0.0  ;;  %878 = vrot.lane.b32.xlu0 %v785_v35, %s1570_s27 }
 0x6d9   :  { %1381 = vmatmul.mubr.msk.f32.vlgmr.msra.gmra.mrb[8].mxu0 %vm48_vm1, %v788_v37 }
 0x749   :  { %v879_v42 = vpop.permute.xlu0 %878 }
 0x7ac   :  { %v873_v39 = vpop.f32.mrb[8].mxu0 }
 0x7ad   :  { %v874_v40 = vadd.f32 %v985_v38, %v873_v39  ;;  %v1382_v41 = vpop.f32.mrb[9].mxu0 }
 0x7af   :  { %v882_v43 = vsel %vm881_vm2, %v874_v40, %v879_v42 }
 0x7b0   :  { %885 = vst.msk [vmem:[%s2119_s9 + $0x8] sm:$0xff] %vm884_vm3, %v882_v43 }

</bundles_post_ra>
